<compile_context>
chip_gen: v7x
topology: tpu7x:2x2x1
jax: 0.10.0
libtpu: 0.0.40
codegen_flags: <defaults>
</compile_context>

<pallas_src>
import functools

import numpy as np
import jax
import jax.numpy as jnp
from jax import lax
from jax.experimental import pallas as pl
from jax.experimental.pallas import tpu as pltpu


# Cap on the packed lane width N: DcolT is (N, 2N) f32 = 8*N^2 bytes and
# block-diagonal, so keep it small (v7x VMEM is only 64 MiB).
_MAX_N = 512


# ----------------------------------------------------------------------------
# Periodic finite-difference operator matrices (built once, in numpy).
# ----------------------------------------------------------------------------
def _diff1_matrix(n, dx):
    """D1 @ u  ->  (u[i+1] - u[i-1]) / (2*dx)   (periodic)."""
    D = np.zeros((n, n), np.float64)
    idx = np.arange(n)
    D[idx, (idx + 1) % n] += 1.0
    D[idx, (idx - 1) % n] -= 1.0
    return (D / (2.0 * dx)).astype(np.float32)


def _diff2_matrix(n, dx):
    """D2 @ u  ->  (u[i+1] - 2*u[i] + u[i-1]) / dx^2   (periodic)."""
    D = np.zeros((n, n), np.float64)
    idx = np.arange(n)
    D[idx, (idx + 1) % n] += 1.0
    D[idx, (idx - 1) % n] += 1.0
    D[idx, idx] -= 2.0
    return (D / (dx * dx)).astype(np.float32)


def _num_steps(T, max_dt):
    return max(1, int(np.ceil(float(T) / float(max_dt) - 1e-12)))


def _chip_hints():
    """(lane_target, prefer_two_blocks) derived from the attached TPU generation."""
    lane_target, prefer_two_blocks = 128, False
    try:
        kind = jax.devices()[0].device_kind.lower()
    except Exception:
        return lane_target, prefer_two_blocks
    if "v6" in kind or "v7" in kind:
        lane_target = 256          # 2x256^2 MXU: fill the contraction dim
    if "v7" in kind:
        prefer_two_blocks = True   # 2 TensorCores per chip: keep grid length >= 2
    return lane_target, prefer_two_blocks


def _choose_packing(B, W, lane_target, prefer_two_blocks):
    """Pick Bt (batch elems per lane-packed slab) and nb (grid length)."""
    g = int(np.gcd(W, 128))
    Bt0 = 128 // g                      # smallest Bt making Bt*W a multiple of 128
    if Bt0 * W > _MAX_N:
        # TODO(synk): for awkward W a lane-dense multiple-of-128 slab would blow
        # the O(N^2) column operator; accept masked stores instead.
        Bt0 = 1
    unit = Bt0 * W
    # smallest multiple of Bt0 that reaches the MXU contraction target ...
    Bt_target = Bt0 * int(np.ceil(lane_target / unit))
    # ... but never pad beyond one slab's worth of real batch
    Bt_batch = Bt0 * int(np.ceil(B / Bt0))
    Bt = max(Bt0, min(Bt_target, Bt_batch))
    while Bt > Bt0 and Bt * W > _MAX_N:
        Bt -= Bt0
    nb = int(np.ceil(B / Bt))
    if prefer_two_blocks:
        # v7x megacore: the "parallel" grid axis only shards across the 2 cores
        # when nb >= 2; trade some lane width for a second block if possible.
        while nb < 2 and Bt > Bt0:
            Bt -= Bt0
            nb = int(np.ceil(B / Bt))
    return Bt, nb


# ----------------------------------------------------------------------------
# Pallas kernel: full explicit time integration for one packed batch slab.
#
#   u        : (H, N)    N = Bt*W packed batch elements along lanes
#   adt      : (H, N)    dt * a / (2*dx), tiled per packed batch slot
#   bdt      : (H, N)    dt * b,          tiled per packed batch slot
#   dcolT    : (N, 2N)   [ blkdiag(D1wT) | dt*nu*blkdiag(D2wT) ]  (y / col derivs)
#   dtnu_dx2 : scalar    dt * nu / dx^2   (x diffusion)
#
# Euler step (one MXU matmul + two XLU sublane rolls + a short VPU combine):
#   c    = u @ dcolT            -> c[:, :N] = u_y ,  c[:, N:] = dt*nu*u_yy
#   u_up = roll(u, -1, axis=0)  -> u[i+1, :]          (periodic)
#   u_dn = roll(u, +1, axis=0)  -> u[i-1, :]
#   rx   = adt*(u_up - u_dn) + dtnu_dx2*(u_up + u_dn - 2u)
#   cy   = bdt*c[:, :N] + c[:, N:]
#   u   <- u + (rx + cy)
# ----------------------------------------------------------------------------
def _cde_timestep_kernel(u_ref, adt_ref, bdt_ref, dcolT_ref, o_ref,
                         *, nsteps, H, N, dtnu_dx2, unroll):
    adt = adt_ref[...]
    bdt = bdt_ref[...]
    dcolT = dcolT_ref[...]

    def one_step(u):
        # y-derivatives: the single remaining MXU matmul (stacked operator).
        c = jnp.dot(u, dcolT, preferred_element_type=jnp.float32)   # (H, 2N)
        # x-derivatives: periodic sublane rolls on the XLU (free slot next to
        # the MXU) instead of a K=H matmul.  Positive shifts only.
        u_up = pltpu.roll(u, H - 1, 0)    # == roll by -1: u[i+1, :]
        u_dn = pltpu.roll(u, 1, 0)        #                 u[i-1, :]
        # Two independent partial sums: the roll/VPU side can retire while the
        # matmul result is still draining (fp adds are not re-associated).
        rx = adt * (u_up - u_dn) + dtnu_dx2 * ((u_up + u_dn) - 2.0 * u)
        cy = bdt * c[:, :N] + c[:, N:]
        return u + (rx + cy)

    u = u_ref[0]                                     # (H, N) slab for this block

    n_major = nsteps // unroll
    if n_major > 0:
        def body(_, uu):
            # manual unroll: gives the scheduler visibility across steps while
            # staying under the 64-vreg budget (unroll=2)
            for _ in range(unroll):
                uu = one_step(uu)
            return uu
        u = lax.fori_loop(0, n_major, body, u)
    for _ in range(nsteps % unroll):
        u = one_step(u)

    o_ref[0] = u                                     # lane-dense (H, N) store


# ----------------------------------------------------------------------------
# Module wrapper (mirrors _CDE's __init__ / properties / forward).
# ----------------------------------------------------------------------------
class CDE2D:
    @property
    def dim(self):
        return 2

    @property
    def timescheme(self):
        return self._timescheme

    @property
    def spatialscheme(self):
        return self._spatialscheme

    @property
    def coe(self):
        return self._coe

    def __init__(self, max_dt=0.0002, mesh_size=(16, 16),
                 mesh_bound=((0, 0), (1, 1)), viscosity=0.2):
        self.max_dt = float(max_dt)
        self.mesh_size = np.array(mesh_size).copy()
        self.mesh_bound = np.array(mesh_bound).copy()
        dx0, dx1 = (self.mesh_bound[1] - self.mesh_bound[0]) / self.mesh_size
        assert abs(dx0 - dx1) < 1e-10
        self.dx = float(dx0)
        self.viscosity = float(viscosity)
        # TODO(synk): _CDE defers the time/spatial scheme to subclasses; forward
        # Euler + 2nd-order periodic central differences are used here.
        self._timescheme = "euler"
        self._spatialscheme = "central2"

        xy = np.mgrid[
            self.mesh_bound[0][0]:self.mesh_bound[1][0]:(self.mesh_size[0] + 1) * 1j,
            self.mesh_bound[0][1]:self.mesh_bound[1][1]:(self.mesh_size[1] + 1) * 1j]
        xy = xy[:, :-1, :-1]
        xy = np.transpose(xy, axes=[1, 2, 0])       # (H, W, 2)
        self.setcoe(xy)

        H, W = int(self.mesh_size[0]), int(self.mesh_size[1])
        # D1h/D2h are only needed by the numpy reference; the kernel replaces
        # the row-derivative matmul with XLU sublane rolls.
        self._d1h = _diff1_matrix(H, self.dx)
        self._d2h = _diff2_matrix(H, self.dx)
        self._d1wT = np.ascontiguousarray(_diff1_matrix(W, self.dx).T)
        self._d2wT = np.ascontiguousarray(_diff2_matrix(W, self.dx).T)

    def setcoe(self, xy):
        # Deterministic "parameters": variable convection coefficients on the mesh.
        x = xy[..., 0]
        y = xy[..., 1]
        a = 0.5 * (np.cos(y) + x * (2.0 * np.pi - x) * np.sin(x)) + 0.6
        b = 2.0 * (np.cos(y) + np.sin(x)) + 0.8
        self._a_np = a.astype(np.float32)
        self._b_np = b.astype(np.float32)
        self._coe = (jnp.asarray(a, jnp.float32), jnp.asarray(b, jnp.float32))

    def predict(self, inputs, T):
        # inputs: NCHW (B, 1, H, W) scalar field, like the PyTorch module.
        B, C, H, W = inputs.shape
        assert C == 1
        assert (H, W) == (int(self.mesh_size[0]), int(self.mesh_size[1]))

        # TODO(synk): nsteps/dt are baked as Python constants; a new T triggers
        # one Mosaic recompile (acceptable for this usage pattern).
        nsteps = _num_steps(T, self.max_dt)
        dt = float(T) / nsteps
        nu = self.viscosity

        # ---- lane packing: Bt batch elements side by side -> N = Bt*W lanes,
        #      N a multiple of 128, sized for the chip's MXU / core count.
        lane_target, prefer_two_blocks = _chip_hints()
        Bt, nb = _choose_packing(B, W, lane_target, prefer_two_blocks)
        B_pad = nb * Bt
        N = Bt * W

        u0 = jnp.asarray(inputs, jnp.float32).reshape(B, H, W)
        if B_pad != B:
            u0 = jnp.concatenate(
                [u0, jnp.zeros((B_pad - B, H, W), jnp.float32)], axis=0)
        # (nb, Bt, H, W) -> (nb, H, Bt, W) -> (nb, H, Bt*W)
        u_packed = u0.reshape(nb, Bt, H, W).transpose(0, 2, 1, 3).reshape(nb, H, N)

        # ---- x-derivative scalings folded into coefficients / a scalar:
        #      convection: dt*a/(2dx) applied to the +/-1 sublane rolls
        #      diffusion : dt*nu/dx^2 applied to the 3-point sublane stencil
        adt = jnp.asarray(
            np.tile((dt / (2.0 * self.dx)) * self._a_np, (1, Bt)), jnp.float32)  # (H, N)
        bdt = jnp.asarray(np.tile(dt * self._b_np, (1, Bt)), jnp.float32)        # (H, N)
        dtnu_dx2 = float(dt * nu / (self.dx * self.dx))

        # ---- y-derivative: stacked block-diagonal column operator, one matmul
        eye = np.eye(Bt, dtype=np.float32)
        dcolT = np.concatenate(
            [np.kron(eye, self._d1wT),
             (dt * nu) * np.kron(eye, self._d2wT)], axis=1).astype(np.float32)   # (N, 2N)

        unroll = min(2, max(1, nsteps))
        kernel = functools.partial(
            _cde_timestep_kernel, nsteps=nsteps, H=H, N=N,
            dtnu_dx2=dtnu_dx2, unroll=unroll)

        out = pl.pallas_call(
            kernel,
            out_shape=jax.ShapeDtypeStruct((nb, H, N), jnp.float32),
            grid_spec=pltpu.PrefetchScalarGridSpec(
                num_scalar_prefetch=0,
                grid=(nb,),
                in_specs=[
                    pl.BlockSpec((1, H, N), lambda i: (i, 0, 0)),   # u slab
                    pl.BlockSpec((H, N), lambda i: (0, 0)),         # dt*a/(2dx)
                    pl.BlockSpec((H, N), lambda i: (0, 0)),         # dt*b
                    pl.BlockSpec((N, 2 * N), lambda i: (0, 0)),     # stacked col op
                ],
                out_specs=pl.BlockSpec((1, H, N), lambda i: (i, 0, 0)),
            ),
            compiler_params=pltpu.CompilerParams(
                dimension_semantics=("parallel",)),
        )(u_packed, adt, bdt, jnp.asarray(dcolT))

        # unpack (nb, H, Bt*W) -> (B, 1, H, W)
        out = out.reshape(nb, H, Bt, W).transpose(0, 2, 1, 3).reshape(B_pad, H, W)
        return out[:B].reshape(B, C, H, W)

    def forward(self, inputs, T, **kw):
        return self.predict(inputs, T, **kw)

    __call__ = forward


# ----------------------------------------------------------------------------
# Independent float64 numpy reference of the same scheme (for a sanity check).
# ----------------------------------------------------------------------------
def _reference_predict(u0, a, b, d1h, d2h, d1wT, d2wT, nsteps, dt, nu):
    u = np.asarray(u0, np.float64)
    a = np.asarray(a, np.float64)
    b = np.asarray(b, np.float64)
    d1h = np.asarray(d1h, np.float64)
    d2h = np.asarray(d2h, np.float64)
    d1wT = np.asarray(d1wT, np.float64)
    d2wT = np.asarray(d2wT, np.float64)
    for _ in range(nsteps):
        ux = np.einsum("ij,bjk->bik", d1h, u)
        uy = np.einsum("bij,jk->bik", u, d1wT)
        uxx = np.einsum("ij,bjk->bik", d2h, u)
        uyy = np.einsum("bij,jk->bik", u, d2wT)
        u = u + dt * (a * ux + b * uy + nu * (uxx + uyy))
    return u


if __name__ == "__main__":
    # B=16 with W=16: 128 or 256 packed lanes per slab depending on the chip,
    # grid of 1-2 blocks (>=2 on v7x so both TensorCores are used).
    B, C, H, W = 16, 1, 16, 16
    model = CDE2D(max_dt=2e-4, mesh_size=(H, W), mesh_bound=((0, 0), (1, 1)))

    key = jax.random.PRNGKey(0)
    x = jax.random.normal(key, (B, C, H, W), dtype=jnp.float32)
    T = 0.002                       # -> 10 explicit Euler steps of dt = 2e-4

    out = model(x, T)
    out = jax.block_until_ready(out)
    assert out.shape == (B, C, H, W)
    assert bool(jnp.all(jnp.isfinite(out)))

    nsteps = _num_steps(T, model.max_dt)
    ref = _reference_predict(np.asarray(x).reshape(B, H, W),
                             model.coe[0], model.coe[1],
                             model._d1h, model._d2h, model._d1wT, model._d2wT,
                             nsteps=nsteps, dt=float(T) / nsteps,
                             nu=model.viscosity)
    np.testing.assert_allclose(np.asarray(out).reshape(B, H, W), ref,
                               rtol=1e-2, atol=1e-2)

    print("KERNEL_OK")
</pallas_src>

<mosaic_0001>
module attributes {stable_mosaic.version = 11 : i64} {
  func.func @_cde_timestep_kernel(%arg0: i32, %arg1: memref<1x16x128xf32, #tpu.memory_space<vmem>>, %arg2: memref<16x128xf32, #tpu.memory_space<vmem>>, %arg3: memref<16x128xf32, #tpu.memory_space<vmem>>, %arg4: memref<128x256xf32, #tpu.memory_space<vmem>>, %arg5: memref<1x16x128xf32, #tpu.memory_space<vmem>>) attributes {dimension_semantics = [#tpu.dimension_semantics<parallel>], iteration_bounds = array<i64: 2>, scalar_prefetch = 0 : i64, scratch_operands = 0 : i64, tpu.core_type = #tpu.core_type<tc>, window_params = [{transform_indices = @transform_0, window_bounds = array<i64: 1, 16, 128>}, {pipeline_mode = #tpu.pipeline_mode<synchronous>, transform_indices = @transform_1, window_bounds = array<i64: 16, 128>}, {pipeline_mode = #tpu.pipeline_mode<synchronous>, transform_indices = @transform_2, window_bounds = array<i64: 16, 128>}, {pipeline_mode = #tpu.pipeline_mode<synchronous>, transform_indices = @transform_3, window_bounds = array<i64: 128, 256>}, {transform_indices = @transform_4, window_bounds = array<i64: 1, 16, 128>}]} {
    %c0 = arith.constant 0 : index
    %c0_0 = arith.constant 0 : index
    %0 = vector.load %arg2[%c0, %c0_0] : memref<16x128xf32, #tpu.memory_space<vmem>>, vector<16x128xf32>
    %c0_1 = arith.constant 0 : index
    %c0_2 = arith.constant 0 : index
    %1 = vector.load %arg3[%c0_1, %c0_2] : memref<16x128xf32, #tpu.memory_space<vmem>>, vector<16x128xf32>
    %c0_3 = arith.constant 0 : index
    %c0_4 = arith.constant 0 : index
    %2 = vector.load %arg4[%c0_3, %c0_4] : memref<128x256xf32, #tpu.memory_space<vmem>>, vector<128x256xf32>
    %c0_5 = arith.constant 0 : index
    %c0_6 = arith.constant 0 : index
    %c0_7 = arith.constant 0 : index
    %3 = vector.load %arg1[%c0_5, %c0_6, %c0_7] : memref<1x16x128xf32, #tpu.memory_space<vmem>>, vector<1x16x128xf32>
    %4 = vector.shape_cast %3 : vector<1x16x128xf32> to vector<16x128xf32>
    %c0_i32 = arith.constant 0 : i32
    %c5_i32 = arith.constant 5 : i32
    %5 = arith.addi %c0_i32, %c5_i32 : i32
    %c1_i32 = arith.constant 1 : i32
    %6 = scf.for %arg6 = %c0_i32 to %5 step %c1_i32 iter_args(%arg7 = %4) -> (vector<16x128xf32>)  : i32 {
      %cst = arith.constant dense<0.000000e+00> : vector<16x256xf32>
      %10 = tpu.matmul %arg7, %2, %cst {dimension_numbers = #tpu.dot_dimension_numbers<[1], [0], [0], [1], [0, 0, 1, 1], [], []>} : vector<16x128xf32>, vector<128x256xf32>, vector<16x256xf32> -> vector<16x256xf32>
      %c15_i32 = arith.constant 15 : i32
      %11 = tpu.dynamic_rotate %arg7 by %c15_i32 dim 0 : vector<16x128xf32>, i32 -> vector<16x128xf32>
      %c1_i32_11 = arith.constant 1 : i32
      %12 = tpu.dynamic_rotate %arg7 by %c1_i32_11 dim 0 : vector<16x128xf32>, i32 -> vector<16x128xf32>
      %13 = arith.subf %11, %12 : vector<16x128xf32>
      %14 = arith.mulf %0, %13 : vector<16x128xf32>
      %15 = arith.addf %11, %12 : vector<16x128xf32>
      %cst_12 = arith.constant 2.000000e+00 : f32
      %16 = vector.broadcast %cst_12 : f32 to vector<16x128xf32>
      %17 = arith.mulf %16, %arg7 : vector<16x128xf32>
      %18 = arith.subf %15, %17 : vector<16x128xf32>
      %cst_13 = arith.constant 1.024000e-02 : f32
      %19 = vector.broadcast %cst_13 : f32 to vector<16x128xf32>
      %20 = arith.mulf %19, %18 : vector<16x128xf32>
      %21 = arith.addf %14, %20 : vector<16x128xf32>
      %22 = vector.extract_strided_slice %10 {offsets = [0, 0], sizes = [16, 128], strides = [1, 1]} : vector<16x256xf32> to vector<16x128xf32>
      %23 = arith.mulf %1, %22 : vector<16x128xf32>
      %24 = vector.extract_strided_slice %10 {offsets = [0, 128], sizes = [16, 128], strides = [1, 1]} : vector<16x256xf32> to vector<16x128xf32>
      %25 = arith.addf %23, %24 : vector<16x128xf32>
      %26 = arith.addf %21, %25 : vector<16x128xf32>
      %27 = arith.addf %arg7, %26 : vector<16x128xf32>
      %cst_14 = arith.constant dense<0.000000e+00> : vector<16x256xf32>
      %28 = tpu.matmul %27, %2, %cst_14 {dimension_numbers = #tpu.dot_dimension_numbers<[1], [0], [0], [1], [0, 0, 1, 1], [], []>} : vector<16x128xf32>, vector<128x256xf32>, vector<16x256xf32> -> vector<16x256xf32>
      %c15_i32_15 = arith.constant 15 : i32
      %29 = tpu.dynamic_rotate %27 by %c15_i32_15 dim 0 : vector<16x128xf32>, i32 -> vector<16x128xf32>
      %c1_i32_16 = arith.constant 1 : i32
      %30 = tpu.dynamic_rotate %27 by %c1_i32_16 dim 0 : vector<16x128xf32>, i32 -> vector<16x128xf32>
      %31 = arith.subf %29, %30 : vector<16x128xf32>
      %32 = arith.mulf %0, %31 : vector<16x128xf32>
      %33 = arith.addf %29, %30 : vector<16x128xf32>
      %cst_17 = arith.constant 2.000000e+00 : f32
      %34 = vector.broadcast %cst_17 : f32 to vector<16x128xf32>
      %35 = arith.mulf %34, %27 : vector<16x128xf32>
      %36 = arith.subf %33, %35 : vector<16x128xf32>
      %cst_18 = arith.constant 1.024000e-02 : f32
      %37 = vector.broadcast %cst_18 : f32 to vector<16x128xf32>
      %38 = arith.mulf %37, %36 : vector<16x128xf32>
      %39 = arith.addf %32, %38 : vector<16x128xf32>
      %40 = vector.extract_strided_slice %28 {offsets = [0, 0], sizes = [16, 128], strides = [1, 1]} : vector<16x256xf32> to vector<16x128xf32>
      %41 = arith.mulf %1, %40 : vector<16x128xf32>
      %42 = vector.extract_strided_slice %28 {offsets = [0, 128], sizes = [16, 128], strides = [1, 1]} : vector<16x256xf32> to vector<16x128xf32>
      %43 = arith.addf %41, %42 : vector<16x128xf32>
      %44 = arith.addf %39, %43 : vector<16x128xf32>
      %45 = arith.addf %27, %44 : vector<16x128xf32>
      scf.yield %45 : vector<16x128xf32>
    }
    %c0_8 = arith.constant 0 : index
    %c0_9 = arith.constant 0 : index
    %c0_10 = arith.constant 0 : index
    %7 = vector.load %arg5[%c0_8, %c0_9, %c0_10] : memref<1x16x128xf32, #tpu.memory_space<vmem>>, vector<1x16x128xf32>
    %8 = vector.shape_cast %7 : vector<1x16x128xf32> to vector<16x128xf32>
    %9 = vector.shape_cast %6 : vector<16x128xf32> to vector<1x16x128xf32>
    tpu.vector_store %arg5[%c0_8, %c0_9, %c0_10], %9 {strides = array<i32>} : memref<1x16x128xf32, #tpu.memory_space<vmem>>, vector<1x16x128xf32>,
    return
  }
  func.func @transform_0(%arg0: i32) -> (i32, i32, i32) {
    %c0_i32 = arith.constant 0 : i32
    %c0_i32_0 = arith.constant 0 : i32
    %c0_i32_1 = arith.constant 0 : i32
    return %arg0, %c0_i32, %c0_i32_0 : i32, i32, i32
  }
  func.func @transform_1(%arg0: i32) -> (i32, i32) {
    %c0_i32 = arith.constant 0 : i32
    %c0_i32_0 = arith.constant 0 : i32
    %c0_i32_1 = arith.constant 0 : i32
    return %c0_i32, %c0_i32_0 : i32, i32
  }
  func.func @transform_2(%arg0: i32) -> (i32, i32) {
    %c0_i32 = arith.constant 0 : i32
    %c0_i32_0 = arith.constant 0 : i32
    %c0_i32_1 = arith.constant 0 : i32
    return %c0_i32, %c0_i32_0 : i32, i32
  }
  func.func @transform_3(%arg0: i32) -> (i32, i32) {
    %c0_i32 = arith.constant 0 : i32
    %c0_i32_0 = arith.constant 0 : i32
    %c0_i32_1 = arith.constant 0 : i32
    return %c0_i32, %c0_i32_0 : i32, i32
  }
  func.func @transform_4(%arg0: i32) -> (i32, i32, i32) {
    %c0_i32 = arith.constant 0 : i32
    %c0_i32_0 = arith.constant 0 : i32
    %c0_i32_1 = arith.constant 0 : i32
    return %arg0, %c0_i32, %c0_i32_0 : i32, i32, i32
  }
}

</mosaic_0001>

<bundles_post_ra>
// kernel: tpu_custom_call.1
= control target key start
LH: loop header
LB: loop body
LE: loop exit
PB: predicated region body
PF: predicated region fallthrough
CT: control target
= control target key end

     0   :  { %9 = vsyncpa [#allocation3], 0  ;;  %s1535_s0 = inlined_call_operand.hbm [shape: f32[2,16,128], index: 0, kind: input, shape index: {}]   ;;  %s1536_s1 = inlined_call_operand.hbm [shape: f32[16,128], index: 1, kind: input, shape index: {}]   ;;  %s1537_s2 = inlined_call_operand.hbm [shape: f32[16,128], index: 2, kind: input, shape index: {}]   ;;  %s1538_s3 = inlined_call_operand.hbm [shape: f32[128,256], index: 3, kind: input, shape index: {}]   ;;  %s1539_s4 = inlined_call_operand.hbm [shape: f32[2,16,128], index: 4, kind: output, shape index: {}]  }
   0x1   :  { %11 = vsyncpa [#allocation3 + $0x1], 0 }
   0x2   :  { %12 = vsyncpa [#allocation6], 0 }
   0x3   :  { %13 = vsyncpa [#allocation9], 0 }
   0x4   :  { %14 = vsyncpa [#allocation4], 0 }
   0x5   :  { %16 = vsyncpa [#allocation4 + $0x1], 0  ;;  %s1098_s15 = smov 0   ;;  %s1100_s16 = smov 0  }
   0x6   :  { %s1102_s17 = smov 0   ;;  %s1104_s18 = smov 0  }
   0x7 LB: > { %s1119_s19 = sadd.s32 4294967295, %s1047_s18   ;;  %s653_s20 = sadd.s32 4294967294, %s1047_s18   ;;  %s1047_s18 = sphi %s1104_s18, %s1564_s18   ;;  %s1043_s17 = sphi %s1102_s17, %s1563_s17   ;;  %s1039_s16 = sphi %s1100_s16, %s1562_s16   ;;  %s1035_s15 = sphi %s1098_s15, %s1561_s15  }
   0x8   : > { %p42_p0 = scmp.ne.s32.totalorder %s1039_s16, %s1035_s15  ;;  %p1540_p1 = scmp.eq.s32.totalorder %s1119_s19, 0 }
   0x9   : > { %p135_p3 = scmp.eq.s32.totalorder %s653_s20, 1  ;;  %p654_p5 = scmp.ge.s32.totalorder %s1047_s18, 1 }
   0xa   : > { %p1128_p4 = por %p1540_p1, %p42_p0  ;;  %p142_p7 = scmp.lt.s32.totalorder %s1047_s18, 3 }
   0xb   : > { %p1133_p6 = por %p135_p3, %p42_p0  ;;  %s1061_s24 = smov [#allocation5]  }
   0xc   : > { %s1543_s21 = scalar_select %p1128_p4, 1, 0 }
   0xd   : > { %s1544_s22 = scalar_select %p1133_p6, 1, 0 }
   0xe   : > { %p1138_p8 = pnand %p654_p5, %p142_p7  ;;  %s154_s25 = sshll.u32 %s1061_s24, 4  ;;  %s1142_s25 = int_to_ptr.vmem [resolvable:$true] %s154_s25 }
   0xf   : > { %s1062_s27 = smov [#allocation7]   ;;  %s1063_s29 = smov [#allocation8]  }
  0x10   : > { %s1545_s23 = scalar_select %p1138_p8, 1, 0 }
  0x11   : > { %p755_p9 = pneg %p1138_p8  ;;  %s167_s28 = sshll.u32 %s1062_s27, 4  ;;  %s1153_s28 = int_to_ptr.vmem [resolvable:$true] %s167_s28 }
  0x12   : > { %s1155_s30 = sshll.u32 %s1063_s29, 4  ;;  %s847_s7 = scalar_lea.hbm %s1536_s1, 256  ;;  %s181_s30 = int_to_ptr.vmem [resolvable:$true] %s1155_s30 }
  0x13   : > { %p1149_p11 = pnand %p755_p9, %p1540_p1  ;;  %p848_p12 = scmp.ne.s32.totalorder %s1536_s1, %s847_s7 }
  0x14   : > { %p854_p5 = scmp.lt.u32.totalorder %s847_s7, %s1536_s1 }
  0x15   : > { %p1165_p13 = pneg %p1149_p11 }
  0x17   : > { %p850_p0 = pnand %p1165_p13, %p848_p12 }
  0x19   : > { %p851_p3 = pneg %p850_p0 }
  0x1b   : > { %p856_p7 = pnand %p854_p5, %p851_p3 }
  0x1d   : > { %859 = shalt.err (!%p856_p7)
}
  0x1e   : > { %s860_s13 = scalar_lea.vmem %s1142_s25, 256  ;;  %p868_p2 = scmp.lt.s32.totalorder %s1142_s25, %s1142_s25 }
  0x1f   : > { %p861_p9 = scmp.ne.s32.totalorder %s1142_s25, %s860_s13  ;;  %p869_p6 = scmp.lt.s32.totalorder %s860_s13, %s860_s13 }
  0x21   : > { %p863_p10 = pnand %p861_p9, %p1165_p13  ;;  %p870_p12 = por %p869_p6, %p868_p2 }
  0x23   : > { %p864_p1 = pneg %p863_p10 }
  0x25   : > { %p871_p0 = pnand %p870_p12, %p864_p1 }
  0x27   : > { %874 = shalt.err (!%p871_p0)
}
  0x28   : > { %s1064_s14 = smov 128   ;;  %s1065_s20 = smov 8  }
  0x29   : > { %758 = dma.hbm_to_vmem [thread:$0]  (!%p1149_p11), %s1536_s1, 256, %s1142_s25, [#allocation6], %s1064_s14, %s1064_s14, %s1065_s20  }
  0x2a   : > { %s875_s6 = scalar_lea.hbm %s1537_s2, 256 }
  0x2b   : > { %p876_p1 = scmp.ne.s32.totalorder %s1537_s2, %s875_s6  ;;  %p882_p10 = scmp.lt.u32.totalorder %s875_s6, %s1537_s2 }
  0x2d   : > { %p878_p2 = pnand %p876_p1, %p1165_p13 }
  0x2f   : > { %p879_p6 = pneg %p878_p2 }
  0x31   : > { %p884_p3 = pnand %p882_p10, %p879_p6 }
  0x33   : > { %887 = shalt.err (!%p884_p3)
}
  0x34   : > { %s888_s25 = scalar_lea.vmem %s1153_s28, 256  ;;  %p896_p12 = scmp.lt.s32.totalorder %s1153_s28, %s1153_s28 }
  0x35   : > { %p889_p5 = scmp.ne.s32.totalorder %s1153_s28, %s888_s25  ;;  %p897_p0 = scmp.lt.s32.totalorder %s888_s25, %s888_s25 }
  0x37   : > { %p891_p7 = pnand %p889_p5, %p1165_p13  ;;  %p898_p1 = por %p897_p0, %p896_p12 }
  0x39   : > { %p892_p9 = pneg %p891_p7 }
  0x3b   : > { %p899_p2 = pnand %p898_p1, %p892_p9 }
  0x3d   : > { %902 = shalt.err (!%p899_p2)
}
  0x3e   : > { %761 = dma.hbm_to_vmem [thread:$0]  (!%p1149_p11), %s1537_s2, 256, %s1153_s28, [#allocation6], %s1064_s14, %s1064_s14, %s1065_s20  }
  0x3f   : > { %s903_s29 = scalar_lea.hbm %s1538_s3, 4096 }
  0x40   : > { %p904_p6 = scmp.ne.s32.totalorder %s1538_s3, %s903_s29  ;;  %p910_p5 = scmp.lt.u32.totalorder %s903_s29, %s1538_s3 }
  0x42   : > { %p906_p10 = pnand %p904_p6, %p1165_p13 }
  0x44   : > { %p907_p3 = pneg %p906_p10 }
  0x46   : > { %p912_p7 = pnand %p910_p5, %p907_p3 }
  0x48   : > { %915 = shalt.err (!%p912_p7)
}
  0x49   : > { %s916_s9 = scalar_lea.vmem %s181_s30, 4096  ;;  %p924_p1 = scmp.lt.s32.totalorder %s181_s30, %s181_s30 }
  0x4a   : > { %p917_p9 = scmp.ne.s32.totalorder %s181_s30, %s916_s9  ;;  %p925_p2 = scmp.lt.s32.totalorder %s916_s9, %s916_s9 }
  0x4c   : > { %p919_p12 = pnand %p917_p9, %p1165_p13  ;;  %p926_p4 = por %p925_p2, %p924_p1 }
  0x4e   : > { %p920_p0 = pneg %p919_p12 }
  0x50   : > { %p927_p8 = pnand %p926_p4, %p920_p0 }
  0x52   : > { %930 = shalt.err (!%p927_p8)
}
  0x53   : > { %s1066_s28 = smov 256   ;;  %s1067_s10 = smov 16  }
  0x54   : > { %764 = dma.hbm_to_vmem [thread:$0]  (!%p1149_p11), %s1538_s3, 4096, %s181_s30, [#allocation9], %s1066_s28, %s1066_s28, %s1067_s10  }
  0x55   : > { %s1235_s12 = sadd.s32 1, %s1047_s18   ;;  %s29_s24 = sadd.s32 1, %s1043_s17 }
  0x56   : > { %s26_s13 = ssub.s32 %s1047_s18, %s1235_s12  ;;  %p36_p8 = scmp.ne.s32.totalorder %s1043_s17, %s1039_s16 }
  0x57   : > { %p27_p4 = scmp.eq.s32.totalorder %s26_s13, 0  ;;  %p37_p13 = scmp.eq.s32.totalorder %s1047_s18, 0 }
  0x58   : > { %p776_p6 = scmp.lt.s32.totalorder %s1047_s18, 2  ;;  %p1548_p3 = scmp.eq.s32.totalorder %s1119_s19, 1 }
  0x59   : > { %s1245_s27 = scalar_select %p27_p4, %s1043_s17, %s29_s24  }
  0x5a   : > { %p38_p10 = por %p37_p13, %p36_p8  ;;  %p1249_p5 = por %p1548_p3, %p36_p8 }
  0x5b   : > { %s194_s26 = sand.u32 1, %s1043_s17   ;;  %s673_s5 = sshll.u32 %s1047_s18, 8 }
  0x5c   : > { %s659_s30 = sshll.u32 %s194_s26, 4  ;;  %s1258_s8 = scalar_lea.hbm %s1535_s0, %s673_s5 }
  0x5d   : > { %s198_s9 = scalar_lea.vmem [#allocation2], %s659_s30  ;;  %p1260_p11 = pnand %p776_p6, %p38_p10 }
  0x5e   : > { %s205_s28 = sshll.u32 %s198_s9, 4  ;;  %s1266_s11 = scalar_lea.sflag [#allocation3], %s194_s26  ;;  %s1264_s28 = int_to_ptr.vmem [resolvable:$true] %s205_s28 }
  0x5f   : > { %s931_s25 = scalar_lea.hbm %s1258_s8, 256  ;;  %p933_p9 = pneg %p1260_p11 }
  0x60   : > { %p932_p7 = scmp.ne.s32.totalorder %s1258_s8, %s931_s25  ;;  %s936_s5 = scalar_lea.hbm %s1535_s0, 512 }
  0x61   : > { %p937_p1 = scmp.lt.u32.totalorder %s1258_s8, %s1535_s0  ;;  %p938_p2 = scmp.lt.u32.totalorder %s936_s5, %s931_s25 }
  0x62   : > { %p934_p12 = pnand %p933_p9, %p932_p7  ;;  %p940_p8 = scmp.lt.u32.totalorder %s931_s25, %s1258_s8 }
  0x63   : > { %p939_p4 = por %p938_p2, %p937_p1 }
  0x64   : > { %p935_p0 = pneg %p934_p12 }
  0x65   : > { %p941_p13 = por %p940_p8, %p939_p4 }
  0x67   : > { %p942_p6 = pnand %p941_p13, %p935_p0 }
  0x69   : > { %945 = shalt.err (!%p942_p6)
}
  0x6a   : > { %s946_s26 = scalar_lea.vmem %s1264_s28, 256  ;;  %s1068_s7 = smov [#allocation2]  }
  0x6b   : > { %p947_p10 = scmp.ne.s32.totalorder %s1264_s28, %s946_s26  ;;  %s951_s9 = sshll.u32 %s1068_s7, 4  ;;  %s952_s9 = int_to_ptr.vmem [resolvable:$false] %s951_s9 }
  0x6c   : > { %s953_s13 = scalar_lea.vmem %s952_s9, 512  ;;  %p954_p12 = scmp.lt.s32.totalorder %s1264_s28, %s952_s9 }
  0x6d   : > { %p949_p3 = pnand %p947_p10, %p933_p9  ;;  %p955_p1 = scmp.lt.s32.totalorder %s953_s13, %s946_s26 }
  0x6f   : > { %p950_p7 = pneg %p949_p3  ;;  %p956_p2 = por %p955_p1, %p954_p12 }
  0x71   : > { %p957_p4 = pnand %p956_p2, %p950_p7 }
  0x73   : > { %960 = shalt.err (!%p957_p4)
}
  0x74   : > { %768 = dma.hbm_to_vmem [thread:$0]  (!%p1260_p11), %s1258_s8, 256, %s1264_s28, %s1266_s11, %s1064_s14, %s1064_s14, %s1065_s20  }
  0x75   : > { %p1551_p9 = scmp.ne.s32.totalorder %s1545_s23, 0 }
  0x76   : > { %s1300_s25 = sand.u32 (!%p1551_p9), 1, %s1039_s16   ;;  %p1552_p0 = scmp.ne.s32.totalorder (!%p1551_p9), %s1543_s21, 0 }
  0x77   : > { %217 = sbr.rel (%p1551_p9) target bundleno = 641 (0x281), region = 36  ;;  %s663_s24 = sshll.u32 (!%p1551_p9), %s1300_s25, 4 }
  0x78   : > { %s220_s5 = scalar_lea.sflag (!%p1551_p9), [#allocation3], %s1300_s25  ;;  %s1306_s10 = scalar_lea.vmem (!%p1551_p9), [#allocation2], %s663_s24 }
  0x7e   : > { %1018 = dma.done.wait (%p1552_p0), %s220_s5, 256  }
  0x7f   : > { %1020 = vsyncadd (%p1552_p0), %s220_s5, 4294967040  ;;  %p1553_p11 = scmp.eq.s32.totalorder %s1119_s19, 0 }
  0x81   : > { %1022 = dma.done.wait (%p1553_p11), [#allocation6], 512   ;;  %p1554_p8 = pmov %p1553_p11 }
  0x83   : > { %1024 = vsyncadd (%p1554_p8), [#allocation6], 4294966784  ;;  %p1555_p13 = pmov %p1554_p8 }
  0x84   : > { %p1556_p6 = pmov %p1554_p8 }
  0x85   : > { %1026 = dma.done.wait (%p1555_p13), [#allocation9], 4096  }
  0x86   : > { %1028 = vsyncadd (%p1556_p6), [#allocation9], 4294963200  ;;  %v1320_v0 = vld [vmem:[#allocation5] sm:$0xff]  ;;  %v1322_v1 = vld [vmem:[#allocation5 + $0x8] sm:$0xff]  ;;  %s1396_s21 = scalar_lea.vmem [#allocation10], %s663_s24  ;;  %s1402_s23 = smov 0  }
  0x87   : > { %v1324_v2 = vld [vmem:[#allocation7] sm:$0xff]  ;;  %v1326_v3 = vld [vmem:[#allocation7 + $0x8] sm:$0xff]  ;;  %v1328_v4 = vld [vmem:[#allocation8] sm:$0xff] }
  0x88   : > { %v1330_v5 = vld [vmem:[#allocation8 + $0x8] sm:$0xff]  ;;  %v1332_v6 = vld [vmem:[#allocation8 + $0x10] sm:$0xff]  ;;  %v1334_v7 = vld [vmem:[#allocation8 + $0x18] sm:$0xff] }
  0x89   : > { %v1336_v8 = vld [vmem:[#allocation8 + $0x20] sm:$0xff]  ;;  %v1338_v9 = vld [vmem:[#allocation8 + $0x28] sm:$0xff]  ;;  %v1340_v10 = vld [vmem:[#allocation8 + $0x30] sm:$0xff] }
  0x8a   : > { %v1342_v11 = vld [vmem:[#allocation8 + $0x38] sm:$0xff]  ;;  %v1344_v12 = vld [vmem:[#allocation8 + $0x40] sm:$0xff]  ;;  %v1346_v13 = vld [vmem:[#allocation8 + $0x48] sm:$0xff] }
  0x8b   : > { %v1348_v14 = vld [vmem:[#allocation8 + $0x50] sm:$0xff]  ;;  %v1350_v15 = vld [vmem:[#allocation8 + $0x58] sm:$0xff]  ;;  %v1352_v16 = vld [vmem:[#allocation8 + $0x60] sm:$0xff] }
  0x8c   : > { %v1354_v17 = vld [vmem:[#allocation8 + $0x68] sm:$0xff]  ;;  %v1356_v18 = vld [vmem:[#allocation8 + $0x70] sm:$0xff]  ;;  %v1358_v19 = vld [vmem:[#allocation8 + $0x78] sm:$0xff] }
  0x8d   : > { %v1360_v20 = vld [vmem:[#allocation8 + $0x80] sm:$0xff]  ;;  %v1362_v21 = vld [vmem:[#allocation8 + $0x88] sm:$0xff]  ;;  %v1364_v22 = vld [vmem:[#allocation8 + $0x90] sm:$0xff] }
  0x8e   : > { %v1366_v23 = vld [vmem:[#allocation8 + $0x98] sm:$0xff]  ;;  %v1368_v24 = vld [vmem:[#allocation8 + $0xa0] sm:$0xff]  ;;  %v1370_v25 = vld [vmem:[#allocation8 + $0xa8] sm:$0xff] }
  0x8f   : > { %v1372_v26 = vld [vmem:[#allocation8 + $0xb0] sm:$0xff]  ;;  %v1374_v27 = vld [vmem:[#allocation8 + $0xb8] sm:$0xff]  ;;  %v1376_v28 = vld [vmem:[#allocation8 + $0xc0] sm:$0xff] }
  0x90   : > { %v1378_v29 = vld [vmem:[#allocation8 + $0xc8] sm:$0xff]  ;;  %v1380_v30 = vld [vmem:[#allocation8 + $0xd0] sm:$0xff]  ;;  %v1382_v31 = vld [vmem:[#allocation8 + $0xd8] sm:$0xff] }
  0x91   : > { %v1384_v32 = vld [vmem:[#allocation8 + $0xe0] sm:$0xff]  ;;  %v1386_v33 = vld [vmem:[#allocation8 + $0xe8] sm:$0xff]  ;;  %v1388_v34 = vld [vmem:[#allocation8 + $0xf0] sm:$0xff] }
  0x92   : > { %v1390_v35 = vld [vmem:[#allocation8 + $0xf8] sm:$0xff]  ;;  %v296_v36 = vld [vmem:[%s1306_s10] sm:$0xff]  }
  0x93   : > { %v297_v37 = vld [vmem:[%s1306_s10 + $0x8] sm:$0xff]  }
  0x94 LB: >> { %v675_v38 = vpack.c.bf16 %v1334_v7, %v1330_v5  ;;  %v677_v39 = vpack.c.bf16 %v1332_v6, %v1328_v4  ;;  %v679_v40 = vpack.c.bf16 %v1342_v11, %v1338_v9  ;;  %v681_v41 = vpack.c.bf16 %v1340_v10, %v1336_v8  ;;  %s303_s23 = sadd.s32 1, %s1059_s23   ;;  %s1059_s23 = sphi %s1402_s23, %s303_s23   ;;  %v1055_v36 = vphi %v296_v36, %v1558_v36   ;;  %v1051_v37 = vphi %v297_v37, %v1557_v37  }
  0x95   : >> { %v683_v42 = vpack.c.bf16 %v1350_v15, %v1346_v13  ;;  %v1069_v43 = vmov 0.0   ;;  %v685_v44 = vpack.c.bf16 %v1348_v14, %v1344_v12  ;;  %v687_v45 = vpack.c.bf16 %v1358_v19, %v1354_v17  ;;  %p300_p10 = scmp.ge.s32.totalorder %s303_s23, 5  }
  0x96   : >> { %676 = vmatprep.subr.bf16.mxu0 %v675_v38  ;;  %708 = vmatprep.subr.bf16.mxu1 %v675_v38  ;;  %v689_v46 = vpack.c.bf16 %v1356_v18, %v1352_v16  ;;  %v691_v47 = vpack.c.bf16 %v1366_v23, %v1362_v21  ;;  %v693_v48 = vpack.c.bf16 %v1364_v22, %v1360_v20  ;;  %v385_v55 = vlaneseq  ;;  %s674_s14 = sshll.u32 (%p300_p10), %s1119_s19, 8  ;;  %s540_s11 = sshll.u32 (%p300_p10), %s1396_s21, 4  ;;  %s1491_s11 = int_to_ptr.vmem [resolvable:$true] %s540_s11 }
  0x97   : >> { %678 = vmatpush1.bf16.msra.mxu0 %v677_v39  ;;  %370 = vmatprep.mubr.f32.mxu0 %v1069_v43  ;;  %v695_v49 = vpack.c.bf16 %v1374_v27, %v1370_v25  ;;  %v697_v50 = vpack.c.bf16 %v1372_v26, %v1368_v24  ;;  %v699_v51 = vpack.c.bf16 %v1382_v31, %v1378_v29  ;;  %v383_v57 = vrot.slane %v1055_v36, 1  ;;  %s1488_s28 = scalar_lea.hbm (%p300_p10), %s1539_s4, %s674_s14  ;;  %s527_s30 = scalar_lea.sflag (%p300_p10), [#allocation4], %s1300_s25 }
  0x98   : >> { %680 = vmatprep.subr.bf16.mxu0 %v679_v40  ;;  %710 = vmatpush1.bf16.msra.mxu1 %v677_v39  ;;  %v701_v52 = vpack.c.bf16 %v1380_v30, %v1376_v28  ;;  %v703_v53 = vpack.c.bf16 %v1390_v35, %v1386_v33  ;;  %v705_v54 = vpack.c.bf16 %v1388_v34, %v1384_v32  ;;  %v386_v56 = vshrl.u32 %v385_v55, 7  ;;  %s961_s6 = scalar_lea.vmem (%p300_p10), %s1491_s11, 256  ;;  %s1070_s26 = smov (%p300_p10), [#allocation10]  }
  0x99   : >> { %712 = vmatprep.subr.bf16.mxu1 %v679_v40  ;;  %481 = vmatprep.mubr.f32.mxu1 %v1069_v43  ;;  %v390_v58 = vrot.slane %v1055_v36, 7  ;;  %v384_v59 = vrot.slane %v1051_v37, 1  ;;  %v391_v60 = vrot.slane %v1051_v37, 7  ;;  %v401_v38 = vmul.f32 2.0, %v1055_v36  ;;  %p962_p3 = scmp.ne.s32.totalorder (%p300_p10), %s1491_s11, %s961_s6  ;;  %s965_s7 = sshll.u32 (%p300_p10), %s1070_s26, 4  ;;  %s966_s7 = int_to_ptr.vmem [resolvable:$false] %s965_s7 }
  0x9a   : >> { %vm387_vm0 = vcmp.lt.s32.totalorder %v386_v56, 7  ;;  %vm392_vm1 = vcmp.lt.s32.totalorder %v386_v56, 1  ;;  %s967_s19 = scalar_lea.vmem (%p300_p10), %s966_s7, 512  ;;  %p968_p1 = scmp.lt.s32.totalorder (%p300_p10), %s1491_s11, %s966_s7 }
  0x9b   : >> { %682 = vmatpush1.bf16.msra.mxu0 %v681_v41  ;;  %v388_v61 = vsel %vm387_vm0, %v383_v57, %v384_v59  ;;  %v394_v62 = vsel %vm392_vm1, %v391_v60, %v390_v58  ;;  %v389_v39 = vsel %vm387_vm0, %v384_v59, %v383_v57  ;;  %v393_v40 = vsel %vm392_vm1, %v390_v58, %v391_v60  ;;  %p963_p7 = pnand (%p300_p10), %p962_p3, %p1249_p5  ;;  %p969_p2 = scmp.lt.s32.totalorder (%p300_p10), %s967_s19, %s961_s6 }
  0x9c   : >> { %684 = vmatprep.subr.bf16.mxu0 %v683_v42  ;;  %714 = vmatpush1.bf16.msra.mxu1 %v681_v41  ;;  %v399_v63 = vadd.f32 %v394_v62, %v388_v61  ;;  %v395_v41 = vsub.f32 %v388_v61, %v394_v62 }
  0x9d   : >> { %716 = vmatprep.subr.bf16.mxu1 %v683_v42  ;;  %p964_p12 = pneg (%p300_p10), %p963_p7  ;;  %p970_p4 = por (%p300_p10), %p969_p2, %p968_p1 }
  0x9e   : >> { %v403_v42 = vsub.f32 %v399_v63, %v401_v38 }
  0x9f   : >> { %686 = vmatpush1.bf16.msra.mxu0 %v685_v44  ;;  %p971_p9 = pnand (%p300_p10), %p970_p4, %p964_p12 }
  0xa0   : >> { %688 = vmatprep.subr.bf16.mxu0 %v687_v45  ;;  %718 = vmatpush1.bf16.msra.mxu1 %v685_v44  ;;  %v400_v44 = vadd.f32 %v393_v40, %v389_v39 }
  0xa1   : >> { %720 = vmatprep.subr.bf16.mxu1 %v687_v45  ;;  %v402_v45 = vmul.f32 2.0, %v1051_v37 }
  0xa3   : >> { %690 = vmatpush1.bf16.msra.mxu0 %v689_v46 }
  0xa4   : >> { %692 = vmatprep.subr.bf16.mxu0 %v691_v47  ;;  %722 = vmatpush1.bf16.msra.mxu1 %v689_v46  ;;  %v397_v46 = vmul.f32 %v395_v41, %v1320_v0 }
  0xa5   : >> { %724 = vmatprep.subr.bf16.mxu1 %v691_v47  ;;  %v405_v47 = vmul.f32 0.01024, %v403_v42 }
  0xa7   : >> { %694 = vmatpush1.bf16.msra.mxu0 %v693_v48 }
  0xa8   : >> { %696 = vmatprep.subr.bf16.mxu0 %v695_v49  ;;  %726 = vmatpush1.bf16.msra.mxu1 %v693_v48  ;;  %v396_v48 = vsub.f32 %v389_v39, %v393_v40 }
  0xa9   : >> { %728 = vmatprep.subr.bf16.mxu1 %v695_v49  ;;  %v404_v49 = vsub.f32 %v400_v44, %v402_v45 }
  0xab   : >> { %698 = vmatpush1.bf16.msra.mxu0 %v697_v50  ;;  %v406_v55 = vmul.f32 0.01024, %v404_v49 }
  0xac   : >> { %700 = vmatprep.subr.bf16.mxu0 %v699_v51  ;;  %730 = vmatpush1.bf16.msra.mxu1 %v697_v50 }
  0xad   : >> { %732 = vmatprep.subr.bf16.mxu1 %v699_v51 }
  0xaf   : >> { %702 = vmatpush1.bf16.msra.mxu0 %v701_v52 }
  0xb0   : >> { %704 = vmatprep.subr.bf16.mxu0 %v703_v53  ;;  %734 = vmatpush1.bf16.msra.mxu1 %v701_v52 }
  0xb1   : >> { %736 = vmatprep.subr.bf16.mxu1 %v703_v53  ;;  %v407_v53 = vadd.f32 %v405_v47, %v397_v46 }
  0xb3   : >> { %706 = vmatpush1.bf16.msra.mxu0 %v705_v54 }
  0xb4   : >> { %738 = vmatpush1.bf16.msra.mxu1 %v705_v54  ;;  %v398_v54 = vmul.f32 %v396_v48, %v1322_v1 }
  0xb6   : >> { %371 = vmatmul.mubr.f32.vlgmr.msra.gmra.mrb[0].mxu0 %v1055_v36  ;;  %v408_v62 = vadd.f32 %v406_v55, %v398_v54 }
  0xb7   : >> { %376 = vmatprep.mubr.f32.mxu0 %v1069_v43 }
  0xba   : >> { %377 = vmatmul.mubr.f32.gmra.mrb[2].mxu0 %v1051_v37 }
 0x189   : >> { %v372_v50 = vpop.f32.mrb[0].mxu0 }
 0x18a   : >> { %v409_v51 = vmul.f32 %v372_v50, %v1324_v2  ;;  %v374_v52 = vpop.f32.mrb[1].mxu0 }
 0x18c   : >> { %v411_v57 = vadd.f32 %v409_v51, %v374_v52 }
 0x18d   : >> { %v378_v58 = vpop.f32.mrb[2].mxu0 }
 0x18e   : >> { %v413_v59 = vadd.f32 %v411_v57, %v407_v53  ;;  %v410_v60 = vmul.f32 %v378_v58, %v1326_v3  ;;  %v380_v61 = vpop.f32.mrb[3].mxu0 }
 0x190   : >> { %v415_v63 = vadd.f32 %v1055_v36, %v413_v59  ;;  %v412_v38 = vadd.f32 %v410_v60, %v380_v61 }
 0x192   : >> { %v414_v39 = vadd.f32 %v412_v38, %v408_v62  ;;  %482 = vmatmul.mubr.f32.vlgmr.msra.gmra.mrb[0].mxu1 %v415_v63  ;;  %v494_v44 = vrot.slane %v415_v63, 1  ;;  %v498_v45 = vrot.slane %v415_v63, 7  ;;  %v508_v50 = vmul.f32 2.0, %v415_v63 }
 0x193   : >> { %487 = vmatprep.mubr.f32.mxu1 %v1069_v43 }
 0x194   : >> { %v416_v40 = vadd.f32 %v1051_v37, %v414_v39 }
 0x196   : >> { %488 = vmatmul.mubr.f32.gmra.mrb[2].mxu1 %v416_v40  ;;  %v495_v41 = vrot.slane %v416_v40, 1  ;;  %v499_v42 = vrot.slane %v416_v40, 7  ;;  %v509_v53 = vmul.f32 2.0, %v416_v40 }
 0x198   : >> { %v496_v46 = vsel %vm387_vm0, %v494_v44, %v495_v41  ;;  %v501_v47 = vsel %vm392_vm1, %v499_v42, %v498_v45  ;;  %v497_v49 = vsel %vm387_vm0, %v495_v41, %v494_v44  ;;  %v500_v36 = vsel %vm392_vm1, %v498_v45, %v499_v42 }
 0x199   : >> { %v506_v48 = vadd.f32 %v501_v47, %v496_v46  ;;  %v507_v52 = vadd.f32 %v500_v36, %v497_v49  ;;  %v502_v43 = vsub.f32 %v496_v46, %v501_v47  ;;  %v503_v60 = vsub.f32 %v497_v49, %v500_v36 }
 0x19b   : >> { %v510_v51 = vsub.f32 %v506_v48, %v508_v50  ;;  %v511_v54 = vsub.f32 %v507_v52, %v509_v53  ;;  %v504_v59 = vmul.f32 %v502_v43, %v1320_v0  ;;  %v505_v44 = vmul.f32 %v503_v60, %v1322_v1 }
 0x19d   : >> { %v512_v37 = vmul.f32 0.01024, %v510_v51  ;;  %v513_v38 = vmul.f32 0.01024, %v511_v54 }
 0x19f   : >> { %v514_v61 = vadd.f32 %v512_v37, %v504_v59  ;;  %v515_v46 = vadd.f32 %v513_v38, %v505_v44 }
 0x265   : >> { %v483_v55 = vpop.f32.mrb[0].mxu1 }
 0x266   : >> { %v516_v57 = vmul.f32 %v483_v55, %v1324_v2  ;;  %v485_v58 = vpop.f32.mrb[1].mxu1 }
 0x268   : >> { %v518_v62 = vadd.f32 %v516_v57, %v485_v58 }
 0x269   : >> { %v489_v39 = vpop.f32.mrb[2].mxu1 }
 0x26a   : >> { %v520_v56 = vadd.f32 %v518_v62, %v514_v61  ;;  %v517_v41 = vmul.f32 %v489_v39, %v1326_v3  ;;  %v491_v42 = vpop.f32.mrb[3].mxu1 }
 0x26c   : >> { %v522_v45 = vadd.f32 %v520_v56, %v415_v63   ;;  %v519_v47 = vadd.f32 %v517_v41, %v491_v42  ;;  %302 = sbr.rel (!%p300_p10) target bundleno = 148 (0x94), region = 100 }
 0x26e   : >> { %v521_v48 = vadd.f32 %v519_v47, %v515_v46  ;;  %v1558_v36 = vmov %v522_v45  ;;  %524 = vst [vmem:[%s1396_s21] sm:$0xff] (%p300_p10), %v522_v45 }
 0x270   : >> { %v523_v50 = vadd.f32 %v521_v48, %v416_v40  }
 0x272   : >> { %v1557_v37 = vmov %v523_v50  ;;  %525 = vst [vmem:[%s1396_s21 + $0x8] sm:$0xff] (%p300_p10), %v523_v50 }
 0x273   : > { %974 = shalt.err (!%p971_p9)
}
 0x274   : > { %s975_s9 = scalar_lea.hbm %s1488_s28, 256  ;;  %s979_s5 = scalar_lea.hbm %s1539_s4, 512 }
 0x275   : > { %p976_p0 = scmp.ne.s32.totalorder %s1488_s28, %s975_s9  ;;  %p980_p13 = scmp.lt.u32.totalorder %s1488_s28, %s1539_s4 }
 0x276   : > { %p981_p6 = scmp.lt.u32.totalorder %s979_s5, %s975_s9  ;;  %p983_p3 = scmp.lt.u32.totalorder %s975_s9, %s1488_s28 }
 0x277   : > { %p977_p11 = pnand %p976_p0, %p1249_p5 }
 0x278   : > { %p982_p10 = por %p981_p6, %p980_p13 }
 0x279   : > { %p978_p8 = pneg %p977_p11 }
 0x27a   : > { %p984_p7 = por %p983_p3, %p982_p10 }
 0x27c   : > { %p985_p12 = pnand %p984_p7, %p978_p8 }
 0x27e   : > { %988 = shalt.err (!%p985_p12)
}
 0x27f   : > { %s1071_s23 = smov 128   ;;  %s1072_s14 = smov 8  }
 0x280   : > { %753 = dma.vmem_to_hbm [thread:$0]  (%p1249_p5), %s1491_s11, 256, %s1488_s28, %s527_s30, %s1071_s23, %s1071_s23, %s1072_s14  }
 0x281 PF: > { %s555_s20 = sand.u32 1, %s1035_s15   ;;  %p1559_p1 = scmp.ne.s32.totalorder %s1544_s22, 0 }
 0x282   : > { %p1560_p2 = scmp.ge.s32.totalorder %s1047_s18, 2  ;;  %s556_s8 = scalar_lea.sflag [#allocation4], %s555_s20 }
 0x284   : > { %p770_p4 = pnand %p1560_p2, %p1559_p1 }
 0x286   : > { %1030 = dma.done.wait (!%p770_p4), %s556_s8, 256  }
 0x287   : > { %1032 = vsyncadd (!%p770_p4), %s556_s8, 4294967040  ;;  %p19_p9 = scmp.ge.s32.totalorder %s1235_s12, 4   ;;  %s1561_s15 = smov %s1039_s16 }
 0x288   : > { %s1562_s16 = smov %s1043_s17  ;;  %s1563_s17 = smov %s1245_s27 }
 0x289   : > { %s1564_s18 = smov %s1235_s12  ;;  %21 = sbr.rel (!%p19_p9) target bundleno = 7 (0x7), region = 111 }
 0x290   :  { %561 = vsyncpa [#allocation3], 1 }
 0x291   :  { %563 = vsyncpa [#allocation3 + $0x1], 1 }
 0x292   :  { %564 = vsyncpa [#allocation6], 1 }
 0x293   :  { %565 = vsyncpa [#allocation9], 1 }
 0x294   :  { %566 = vsyncpa [#allocation4], 1 }
 0x295   :  { %568 = vsyncpa [#allocation4 + $0x1], 1 }

</bundles_post_ra>
